<compile_context>
chip_gen: v7x
topology: tpu7x:2x2x1
jax: 0.10.0
libtpu: 0.0.40
codegen_flags: <defaults>
</compile_context>

<pallas_src>
import functools

import jax
import jax.numpy as jnp
from jax import lax
from jax.experimental import pallas as pl
from jax.experimental.pallas import tpu as pltpu


def _self_attention_kernel(xt_ref, a_ref, wkbq_ref, wvt_ref, bv_ref, o_ref, *,
                           mxu_dtype):
    # Block shapes (per grid step (b, q)):
    #   xt_ref  : (1, C, N)  x for batch b, channel-major; resident across q steps
    #   a_ref   : (C, C)     A = Wq Wk^T            (fused projection)
    #   wkbq_ref: (1, C)     (Wk bq)^T              (query-side bias fold)
    #   wvt_ref : (C, C)     Wv^T
    #   bv_ref  : (C, 1)     value bias (column)
    #   o_ref   : (1, C, TQ) output tile, channel-major (lane-dense stores)
    qt = pl.program_id(1)
    tq = o_ref.shape[-1]
    n = xt_ref.shape[-1]

    start = qt * tq
    if tq % 128 == 0:
        start = pl.multiple_of(start, 128)

    xt = xt_ref[0]                                   # (C, N)  f32
    x_q = xt_ref[0, :, pl.ds(start, tq)]             # (C, TQ) f32, aligned lane slice

    # MXU operands in mxu_dtype (bf16 by default, f32 accumulation).
    # Element-wise / transcendental math stays f32 (v5e has no bf16 VPU/EUP).
    xt_mx = xt.astype(mxu_dtype)
    xq_mx = x_q.T.astype(mxu_dtype)                  # (TQ, C): cheap in-kernel transpose
    a_mx = a_ref[...].astype(mxu_dtype)
    wvt_mx = wvt_ref[...].astype(mxu_dtype)

    # scores[i, j] = (x_i A + Wk bq) . x_j   (i-only / constant bias terms cancel
    # inside the softmax; contraction depth is C, full MXU depth for C >= 8).
    t = jnp.dot(xq_mx, a_mx, preferred_element_type=jnp.float32)          # (TQ, C)
    t = t + wkbq_ref[...]                                                  # bias fold (f32)
    scores = jnp.dot(t.astype(mxu_dtype), xt_mx,
                     preferred_element_type=jnp.float32)                   # (TQ, N)

    # Softmax over j with deferred normalization.
    m = jnp.max(scores, axis=-1, keepdims=True)                            # (TQ, 1)
    p = jnp.exp(scores - m)                                                # f32 EUP
    p_mx = p.astype(mxu_dtype)

    # hT[c, i] = sum_j x[c, j] * p[i, j]  (contract over N).  The extra ones-row
    # matmul yields the softmax denominators already in row (lane) orientation.
    hT = lax.dot_general(xt_mx, p_mx, (((1,), (1,)), ((), ())),
                         preferred_element_type=jnp.float32)               # (C, TQ)
    denom = lax.dot_general(jnp.ones((8, n), mxu_dtype), p_mx,
                            (((1,), (1,)), ((), ())),
                            preferred_element_type=jnp.float32)[0:1]       # (1, TQ), >= 1
    inv = pl.reciprocal(denom, approx=True)
    inv = inv * (2.0 - denom * inv)        # one Newton step -> ~f32 accuracy

    # out^T = Wv^T (hT / denom) + bv + x_q   (value projection after attention;
    # valid because softmax rows sum to 1).
    outT = jnp.dot(wvt_mx, hT, preferred_element_type=jnp.float32)         # (C, TQ)
    outT = outT * inv + bv_ref[...] + x_q

    o_ref[0] = outT.astype(o_ref.dtype)


def _tpu_vmem_capacity_bytes():
    try:
        return int(pltpu.get_tpu_info().vmem_capacity_bytes)
    except Exception:
        return 64 * 1024 * 1024        # assume the smallest per-core VMEM (v7x)


def _vmem_config():
    """(score-intermediate budget, vmem_limit_bytes), generation-aware."""
    phys = _tpu_vmem_capacity_bytes()
    if phys >= 128 * 1024 * 1024:                   # v5e / v6e: bigger tiles amortize per-step cost
        return 28 * 1024 * 1024, 96 * 1024 * 1024
    return 14 * 1024 * 1024, 40 * 1024 * 1024       # v7x (64 MiB/TC): caps TQ ~256, leaves headroom


def _pick_tq(n, score_budget_bytes):
    # Largest lane-friendly query tile whose f32 score-sized intermediates
    # (~3 x TQ x N x 4 bytes) stay inside the per-generation budget.
    cands = [c for c in (512, 256, 128) if n % c == 0]
    for cand in cands:
        if 3 * cand * n * 4 <= score_budget_bytes:
            return cand
    if cands:
        return cands[-1]     # 128: smallest lane-friendly tile
    return n                 # N not a multiple of 128: single full tile (always legal)


@functools.partial(jax.jit, static_argnames=("tq", "vmem_limit_bytes", "mxu_dtype"))
def _self_attention_impl(x_nchw, wq, bq, wk, wv, bv, *, tq, vmem_limit_bytes,
                         mxu_dtype):
    B, C, W, H = x_nchw.shape
    N = W * H
    nt = N // tq

    x_bcn = x_nchw.reshape(B, C, N)          # channel-major; free reshape, only x pass

    # Fused parameters (tiny, O(C^2) wrapper compute; no pass over x).
    a_mat = jnp.dot(wq, wk.T)                # (C, C) = Wq Wk^T
    wkbq = jnp.dot(wk, bq).reshape(1, C)     # (1, C) = (Wk bq)^T
    wvT = wv.T                               # (C, C)
    bv_col = bv.reshape(C, 1)                # (C, 1)

    kernel = functools.partial(_self_attention_kernel, mxu_dtype=mxu_dtype)

    out_bcn = pl.pallas_call(
        kernel,
        out_shape=jax.ShapeDtypeStruct((B, C, N), x_nchw.dtype),
        grid_spec=pltpu.PrefetchScalarGridSpec(
            num_scalar_prefetch=0,
            grid=(B, nt),
            in_specs=[
                pl.BlockSpec((1, C, N), lambda b, q: (b, 0, 0)),   # x, resident per batch
                pl.BlockSpec((C, C), lambda b, q: (0, 0)),         # A = Wq Wk^T
                pl.BlockSpec((1, C), lambda b, q: (0, 0)),         # Wk bq
                pl.BlockSpec((C, C), lambda b, q: (0, 0)),         # Wv^T
                pl.BlockSpec((C, 1), lambda b, q: (0, 0)),         # bv
            ],
            out_specs=pl.BlockSpec((1, C, tq), lambda b, q: (b, 0, q)),
        ),
        compiler_params=pltpu.CompilerParams(
            dimension_semantics=("parallel", "parallel"),
            vmem_limit_bytes=vmem_limit_bytes,
        ),
    )(x_bcn, a_mat, wkbq, wvT, bv_col)

    return out_bcn.reshape(B, C, W, H)       # free reshape (already channel-major)


def self_attention(x_nchw, wq, bq, wk, bk, wv, bv, *, mxu_dtype=jnp.bfloat16,
                   tq=None):
    """x_nchw: (B, C, W, H).  wq/wk: (C, C//8), wv: (C, C) (1x1 convs stored as
    (C_in, C_out)); bq/bk: (C//8,), bv: (C,).  bk cancels inside the softmax."""
    del bk  # the (j-independent) key-bias term cancels in the row softmax
    B, C, W, H = x_nchw.shape
    N = W * H
    score_budget, vmem_limit = _vmem_config()
    if tq is None:
        tq = _pick_tq(N, score_budget)
    assert N % tq == 0, "query tile must divide the spatial size"
    return _self_attention_impl(x_nchw, wq, bq, wk, wv, bv, tq=tq,
                                vmem_limit_bytes=vmem_limit, mxu_dtype=mxu_dtype)


def _reference(x_nchw, wq, bq, wk, bk, wv, bv):
    """Pure-JAX reference mirroring the PyTorch forward (unfused)."""
    B, C, W, H = x_nchw.shape
    N = W * H
    x_flat = x_nchw.reshape(B, C, N)                                   # (B, C, N)
    q = jnp.einsum("bcn,cd->bdn", x_flat, wq) + bq[None, :, None]      # (B, C8, N)
    k = jnp.einsum("bcn,cd->bdn", x_flat, wk) + bk[None, :, None]      # (B, C8, N)
    v = jnp.einsum("bcn,cd->bdn", x_flat, wv) + bv[None, :, None]      # (B, C, N)
    energy = jnp.einsum("bdi,bdj->bij", q, k)                          # (B, N, N)
    attn = jax.nn.softmax(energy, axis=-1)
    out = jnp.einsum("bcj,bij->bci", v, attn)                          # (B, C, N)
    return out.reshape(B, C, W, H) + x_nchw


if __name__ == "__main__":
    key = jax.random.PRNGKey(0)
    B, C, W, H = 2, 16, 16, 16        # in_dim = 16 -> C//8 = 2, N = 256
    C8 = C // 8

    k_x, k_wq, k_bq, k_wk, k_bk, k_wv, k_bv = jax.random.split(key, 7)
    x = jax.random.normal(k_x, (B, C, W, H), dtype=jnp.float32)

    # Conv2d 1x1 parameters: torch weight (Cout, Cin, 1, 1) stored as (Cin, Cout).
    wq = jax.random.normal(k_wq, (C, C8), dtype=jnp.float32) * 0.1
    bq = jax.random.normal(k_bq, (C8,), dtype=jnp.float32) * 0.1
    wk = jax.random.normal(k_wk, (C, C8), dtype=jnp.float32) * 0.1
    bk = jax.random.normal(k_bk, (C8,), dtype=jnp.float32) * 0.1
    wv = jax.random.normal(k_wv, (C, C), dtype=jnp.float32) * 0.1
    bv = jax.random.normal(k_bv, (C,), dtype=jnp.float32) * 0.1

    ref = _reference(x, wq, bq, wk, bk, wv, bv)

    # 1) f32 MXU operands: exact-path check against the unfused reference.
    out_f32 = jax.block_until_ready(
        self_attention(x, wq, bq, wk, bk, wv, bv, mxu_dtype=jnp.float32))
    assert out_f32.shape == (B, C, W, H)
    assert jnp.allclose(out_f32, ref, atol=1e-4, rtol=1e-4), "f32 mismatch vs reference"

    # 2) Default bf16 MXU operands (f32 accumulation): looser tolerance.
    out = jax.block_until_ready(self_attention(x, wq, bq, wk, bk, wv, bv))
    assert out.shape == (B, C, W, H)
    assert jnp.allclose(out, ref, atol=1e-2, rtol=1e-2), "bf16 mismatch vs reference"

    # 3) Multi-tile path (2 query tiles) to exercise the tiling / dynamic slice.
    out_mt = jax.block_until_ready(
        self_attention(x, wq, bq, wk, bk, wv, bv, tq=128))
    assert jnp.allclose(out_mt, ref, atol=1e-2, rtol=1e-2), "tiled mismatch vs reference"

    print("KERNEL_OK")
</pallas_src>

<mosaic_0001>
module attributes {stable_mosaic.version = 11 : i64} {
  func.func @_self_attention_kernel(%arg0: i32, %arg1: i32, %arg2: memref<1x16x256xf32, #tpu.memory_space<vmem>>, %arg3: memref<16x16xf32, #tpu.memory_space<vmem>>, %arg4: memref<1x16xf32, #tpu.memory_space<vmem>>, %arg5: memref<16x16xf32, #tpu.memory_space<vmem>>, %arg6: memref<16x1xf32, #tpu.memory_space<vmem>>, %arg7: memref<1x16x256xf32, #tpu.memory_space<vmem>>) attributes {dimension_semantics = [#tpu.dimension_semantics<parallel>, #tpu.dimension_semantics<parallel>], iteration_bounds = array<i64: 2, 1>, scalar_prefetch = 0 : i64, scratch_operands = 0 : i64, tpu.core_type = #tpu.core_type<tc>, window_params = [{transform_indices = @transform_0, window_bounds = array<i64: 1, 16, 256>}, {pipeline_mode = #tpu.pipeline_mode<synchronous>, transform_indices = @transform_1, window_bounds = array<i64: 16, 16>}, {pipeline_mode = #tpu.pipeline_mode<synchronous>, transform_indices = @transform_2, window_bounds = array<i64: 1, 16>}, {pipeline_mode = #tpu.pipeline_mode<synchronous>, transform_indices = @transform_3, window_bounds = array<i64: 16, 16>}, {pipeline_mode = #tpu.pipeline_mode<synchronous>, transform_indices = @transform_4, window_bounds = array<i64: 16, 1>}, {transform_indices = @transform_5, window_bounds = array<i64: 1, 16, 256>}]} {
    %c256_i32 = arith.constant 256 : i32
    %0 = arith.muli %arg1, %c256_i32 : i32
    %1 = tpu.assume_multiple %0, 128 : i32
    %c0 = arith.constant 0 : index
    %c0_0 = arith.constant 0 : index
    %c0_1 = arith.constant 0 : index
    %2 = vector.load %arg2[%c0, %c0_0, %c0_1] : memref<1x16x256xf32, #tpu.memory_space<vmem>>, vector<1x16x256xf32>
    %3 = vector.shape_cast %2 : vector<1x16x256xf32> to vector<16x256xf32>
    %c0_2 = arith.constant 0 : index
    %c0_3 = arith.constant 0 : index
    %4 = arith.index_cast %1 : i32 to index
    %5 = vector.load %arg2[%c0_2, %c0_3, %4] : memref<1x16x256xf32, #tpu.memory_space<vmem>>, vector<1x16x256xf32>
    %6 = vector.shape_cast %5 : vector<1x16x256xf32> to vector<16x256xf32>
    %7 = tpu.transpose %6, [1, 0] : vector<16x256xf32> -> vector<256x16xf32>
    %c0_4 = arith.constant 0 : index
    %c0_5 = arith.constant 0 : index
    %8 = vector.load %arg3[%c0_4, %c0_5] : memref<16x16xf32, #tpu.memory_space<vmem>>, vector<16x16xf32>
    %c0_6 = arith.constant 0 : index
    %c0_7 = arith.constant 0 : index
    %9 = vector.load %arg5[%c0_6, %c0_7] : memref<16x16xf32, #tpu.memory_space<vmem>>, vector<16x16xf32>
    %cst = arith.constant dense<0.000000e+00> : vector<256x16xf32>
    %10 = tpu.matmul %7, %8, %cst {dimension_numbers = #tpu.dot_dimension_numbers<[1], [0], [0], [1], [0, 0, 1, 1], [], []>} : vector<256x16xf32>, vector<16x16xf32>, vector<256x16xf32> -> vector<256x16xf32>
    %c0_8 = arith.constant 0 : index
    %c0_9 = arith.constant 0 : index
    %11 = vector.load %arg4[%c0_8, %c0_9] : memref<1x16xf32, #tpu.memory_space<vmem>>, vector<1x16xf32>
    %12 = vector.broadcast %11 : vector<1x16xf32> to vector<256x16xf32>
    %13 = arith.addf %10, %12 : vector<256x16xf32>
    %cst_10 = arith.constant dense<0.000000e+00> : vector<256x256xf32>
    %14 = tpu.matmul %13, %3, %cst_10 {dimension_numbers = #tpu.dot_dimension_numbers<[1], [0], [0], [1], [0, 0, 1, 1], [], []>} : vector<256x16xf32>, vector<16x256xf32>, vector<256x256xf32> -> vector<256x256xf32>
    %cst_11 = arith.constant dense<0xFF800000> : vector<256xf32>
    %15 = vector.multi_reduction <maximumf>, %14, %cst_11 [1] : vector<256x256xf32> to vector<256xf32>
    %16 = vector.shape_cast %15 : vector<256xf32> to vector<256x1xf32>
    %17 = vector.broadcast %16 : vector<256x1xf32> to vector<256x256xf32>
    %18 = arith.subf %14, %17 : vector<256x256xf32>
    %19 = math.exp %18 : vector<256x256xf32>
    %cst_12 = arith.constant dense<0.000000e+00> : vector<16x256xf32>
    %20 = tpu.matmul %3, %19, %cst_12 {dimension_numbers = #tpu.dot_dimension_numbers<[1], [1], [0], [0], [0, 0, 1, 0], [], []>} : vector<16x256xf32>, vector<256x256xf32>, vector<16x256xf32> -> vector<16x256xf32>
    %cst_13 = arith.constant 1.000000e+00 : f32
    %21 = vector.broadcast %cst_13 : f32 to vector<8x256xf32>
    %cst_14 = arith.constant dense<0.000000e+00> : vector<8x256xf32>
    %22 = tpu.matmul %21, %19, %cst_14 {dimension_numbers = #tpu.dot_dimension_numbers<[1], [1], [0], [0], [0, 0, 1, 0], [], []>} : vector<8x256xf32>, vector<256x256xf32>, vector<8x256xf32> -> vector<8x256xf32>
    %23 = vector.extract_strided_slice %22 {offsets = [0, 0], sizes = [1, 256], strides = [1, 1]} : vector<8x256xf32> to vector<1x256xf32>
    %24 = tpu.reciprocal %23 {approx = true} : vector<1x256xf32> -> vector<1x256xf32>
    %25 = arith.mulf %23, %24 : vector<1x256xf32>
    %cst_15 = arith.constant 2.000000e+00 : f32
    %26 = vector.broadcast %cst_15 : f32 to vector<1x256xf32>
    %27 = arith.subf %26, %25 : vector<1x256xf32>
    %28 = arith.mulf %24, %27 : vector<1x256xf32>
    %cst_16 = arith.constant dense<0.000000e+00> : vector<16x256xf32>
    %29 = tpu.matmul %9, %20, %cst_16 {dimension_numbers = #tpu.dot_dimension_numbers<[1], [0], [0], [1], [0, 0, 1, 1], [], []>} : vector<16x16xf32>, vector<16x256xf32>, vector<16x256xf32> -> vector<16x256xf32>
    %30 = vector.broadcast %28 : vector<1x256xf32> to vector<16x256xf32>
    %31 = arith.mulf %29, %30 : vector<16x256xf32>
    %c0_17 = arith.constant 0 : index
    %c0_18 = arith.constant 0 : index
    %32 = vector.load %arg6[%c0_17, %c0_18] : memref<16x1xf32, #tpu.memory_space<vmem>>, vector<16x1xf32>
    %33 = vector.broadcast %32 : vector<16x1xf32> to vector<16x256xf32>
    %34 = arith.addf %31, %33 : vector<16x256xf32>
    %35 = arith.addf %34, %6 : vector<16x256xf32>
    %c0_19 = arith.constant 0 : index
    %c0_20 = arith.constant 0 : index
    %c0_21 = arith.constant 0 : index
    %36 = vector.load %arg7[%c0_19, %c0_20, %c0_21] : memref<1x16x256xf32, #tpu.memory_space<vmem>>, vector<1x16x256xf32>
    %37 = vector.shape_cast %36 : vector<1x16x256xf32> to vector<16x256xf32>
    %38 = vector.shape_cast %35 : vector<16x256xf32> to vector<1x16x256xf32>
    tpu.vector_store %arg7[%c0_19, %c0_20, %c0_21], %38 {strides = array<i32>} : memref<1x16x256xf32, #tpu.memory_space<vmem>>, vector<1x16x256xf32>,
    return
  }
  func.func @transform_0(%arg0: i32, %arg1: i32) -> (i32, i32, i32) {
    %c0_i32 = arith.constant 0 : i32
    %c0_i32_0 = arith.constant 0 : i32
    %c0_i32_1 = arith.constant 0 : i32
    return %arg0, %c0_i32, %c0_i32_0 : i32, i32, i32
  }
  func.func @transform_1(%arg0: i32, %arg1: i32) -> (i32, i32) {
    %c0_i32 = arith.constant 0 : i32
    %c0_i32_0 = arith.constant 0 : i32
    %c0_i32_1 = arith.constant 0 : i32
    return %c0_i32, %c0_i32_0 : i32, i32
  }
  func.func @transform_2(%arg0: i32, %arg1: i32) -> (i32, i32) {
    %c0_i32 = arith.constant 0 : i32
    %c0_i32_0 = arith.constant 0 : i32
    %c0_i32_1 = arith.constant 0 : i32
    return %c0_i32, %c0_i32_0 : i32, i32
  }
  func.func @transform_3(%arg0: i32, %arg1: i32) -> (i32, i32) {
    %c0_i32 = arith.constant 0 : i32
    %c0_i32_0 = arith.constant 0 : i32
    %c0_i32_1 = arith.constant 0 : i32
    return %c0_i32, %c0_i32_0 : i32, i32
  }
  func.func @transform_4(%arg0: i32, %arg1: i32) -> (i32, i32) {
    %c0_i32 = arith.constant 0 : i32
    %c0_i32_0 = arith.constant 0 : i32
    %c0_i32_1 = arith.constant 0 : i32
    return %c0_i32, %c0_i32_0 : i32, i32
  }
  func.func @transform_5(%arg0: i32, %arg1: i32) -> (i32, i32, i32) {
    %c0_i32 = arith.constant 0 : i32
    %c0_i32_0 = arith.constant 0 : i32
    return %arg0, %c0_i32, %arg1 : i32, i32, i32
  }
}

</mosaic_0001>

<bundles_post_ra>
// kernel: _self_attention_impl.1
= control target key start
LH: loop header
LB: loop body
LE: loop exit
PB: predicated region body
PF: predicated region fallthrough
CT: control target
= control target key end

     0   :  { %s2185_s18 = smov 0   ;;  %s2187_s19 = smov 0   ;;  %s2669_s0 = inlined_call_operand.vmem [shape: f32[2,16,256], index: 0, kind: input, shape index: {}]   ;;  %s2670_s1 = inlined_call_operand.vmem [shape: f32[16,16], index: 1, kind: input, shape index: {}]   ;;  %s2671_s2 = inlined_call_operand.vmem [shape: f32[1,16], index: 2, kind: input, shape index: {}]   ;;  %s2672_s3 = inlined_call_operand.vmem [shape: f32[16,16], index: 3, kind: input, shape index: {}]   ;;  %s2673_s4 = inlined_call_operand.vmem [shape: f32[16,1], index: 4, kind: input, shape index: {}]   ;;  %s2674_s5 = inlined_call_operand.vmem [shape: f32[2,16,256], index: 5, kind: output, shape index: {}]  }
   0x1   :  { %s2189_s20 = smov 0  }
   0x2 LB: > { %s27_s21 = sadd.s32 1, %s2146_s19  ;;  %p1661_p0 = scmp.ge.s32.totalorder %s2150_s20, 1  ;;  %s2150_s20 = sphi %s2189_s20, %s15_s20   ;;  %s2146_s19 = sphi %s2187_s19, %s2718_s19   ;;  %s2142_s18 = sphi %s2185_s18, %s2717_s18  }
   0x3   : > { %p29_p1 = scmp.ge.s32.totalorder %s27_s21, 2  ;;  %p201_p2 = scmp.lt.s32.totalorder %s2150_s20, 3 }
   0x5   : > { %s2720_s21 = smov (%p29_p1, %s27_s21), 0  ;;  %p202_p3 = pnand %p1661_p0, %p201_p2 }
   0x7   : > { %205 = sbr.rel (%p202_p3) target bundleno = 1322 (0x52a), region = 40 }
   0xe   : > { %p233_p4 = scmp.lt.s32.totalorder %s2142_s18, 1  ;;  %v325_v0 = vld [vmem:[%s2670_s1] sm:$0xff]  ;;  %v326_v1 = vld [vmem:[%s2670_s1 + $0x8] sm:$0xff]  ;;  %vm336_vm0 = vcmask 130048   ;;  %v2675_v41 = vmov 0.0  }
   0xf   : > { %v1823_v4 = vpack.c.bf16 %v326_v1, %v325_v0  ;;  %818 = vmatprep.mubr.f32.mxu1 %v2675_v41  ;;  %v2276_v42 = vld [vmem:[%s2671_s2] ss:$0 sm:$0xff] }
  0x10   : > { %s2722_s18 = smov (!%p233_p4, %s2142_s18), 1 }
  0x11   : > { %s1735_s22 = sshll.u32 %s2722_s18, 5  ;;  %1824 = vmatprep.subr.bf16.mxu0 %v1823_v4 }
  0x12   : > { %s2211_s25 = scalar_lea.vmem %s2669_s0, %s1735_s22  ;;  %1826 = vmatpush3.bf16.msra.mxu0 %v1823_v4  ;;  %s246_s17 = scalar_lea.vmem %s2674_s5, %s1735_s22 }
  0x13   : > { %v2220_v2 = vld [vmem:[%s2211_s25] sm:$0xff]  ;;  %v2223_v3 = vld [vmem:[%s2211_s25 + $0x8] sm:$0xff]  ;;  %v2228_v5 = vld [vmem:[%s2211_s25 + $0x10] sm:$0xff] }
  0x14   : > { %261 = vxpose.xlu0.b32.start [1/2] (short) %v2220_v2, 128  ;;  %293 = vxpose.xlu1.b32.start [1/2] (short) %v2223_v3, 128  ;;  %v2231_v6 = vld [vmem:[%s2211_s25 + $0x18] sm:$0xff]  ;;  %v1829_v39 = vpack.c.bf16 %v2228_v5, %v2220_v2 }
  0x15   : > { %v1827_v38 = vpack.c.bf16 %v2231_v6, %v2223_v3 }
  0x17   : > { %1828 = vmatprep.subr.bf16.mxu1 %v1827_v38 }
  0x18   : > { %262 = vxpose.xlu0.b32.end [2/2] (short) %v2228_v5, 128  ;;  %294 = vxpose.xlu1.b32.end [2/2] (short) %v2231_v6, 128 }
  0x19   : > { %1830 = vmatpush1.bf16.msra.mxu1 %v1829_v39 }
  0x94   : > { %v277_v7 = vpop.trf.xlu0  ;;  %v309_v8 = vpop.trf.xlu1 }
  0x95   : > { %1775 = vmatprep.mubr.msk.f32.mxu0 %vm336_vm0, %v277_v7 }
  0x98   : > { %v278_v9 = vpop.trf.xlu0  ;;  %v310_v10 = vpop.trf.xlu1 }
  0x99   : > { %1776 = vmatmul.mubr.msk.f32.vlgmr.msra.gmra.mrb[0].mxu0 %vm336_vm0, %v278_v9 }
  0x9c   : > { %v279_v11 = vpop.trf.xlu0  ;;  %v311_v13 = vpop.trf.xlu1 }
  0x9d   : > { %1778 = vmatprep.mubr.msk.f32.mxu0 %vm336_vm0, %v279_v11 }
  0xa0   : > { %v280_v12 = vpop.trf.xlu0  ;;  %v312_v15 = vpop.trf.xlu1 }
  0xa1   : > { %1779 = vmatmul.mubr.msk.f32.gmra.mrb[2].mxu0 %vm336_vm0, %v280_v12 }
  0xa4   : > { %v281_v14 = vpop.trf.xlu0  ;;  %v313_v18 = vpop.trf.xlu1 }
  0xa5   : > { %1781 = vmatprep.mubr.msk.f32.mxu0 %vm336_vm0, %v281_v14 }
  0xa8   : > { %v282_v16 = vpop.trf.xlu0  ;;  %v314_v20 = vpop.trf.xlu1 }
  0xa9   : > { %1782 = vmatmul.mubr.msk.f32.gmra.mrb[4].mxu0 %vm336_vm0, %v282_v16 }
  0xac   : > { %v283_v17 = vpop.trf.xlu0  ;;  %v315_v23 = vpop.trf.xlu1 }
  0xad   : > { %1784 = vmatprep.mubr.msk.f32.mxu0 %vm336_vm0, %v283_v17 }
  0xb0   : > { %v284_v19 = vpop.trf.xlu0  ;;  %v316_v25 = vpop.trf.xlu1 }
  0xb1   : > { %1785 = vmatmul.mubr.msk.f32.gmra.mrb[6].mxu0 %vm336_vm0, %v284_v19 }
  0xb4   : > { %v285_v21 = vpop.trf.xlu0  ;;  %v317_v28 = vpop.trf.xlu1 }
  0xb5   : > { %1787 = vmatprep.mubr.msk.f32.mxu0 %vm336_vm0, %v285_v21 }
  0xb8   : > { %v286_v22 = vpop.trf.xlu0  ;;  %v318_v30 = vpop.trf.xlu1 }
  0xb9   : > { %1788 = vmatmul.mubr.msk.f32.gmra.mrb[8].mxu0 %vm336_vm0, %v286_v22 }
  0xbc   : > { %v287_v24 = vpop.trf.xlu0  ;;  %v319_v33 = vpop.trf.xlu1 }
  0xbd   : > { %1790 = vmatprep.mubr.msk.f32.mxu0 %vm336_vm0, %v287_v24 }
  0xc0   : > { %v288_v26 = vpop.trf.xlu0  ;;  %v320_v34 = vpop.trf.xlu1 }
  0xc1   : > { %1791 = vmatmul.mubr.msk.f32.gmra.mrb[10].mxu0 %vm336_vm0, %v288_v26 }
  0xc4   : > { %v289_v27 = vpop.trf.xlu0  ;;  %v321_v35 = vpop.trf.xlu1 }
  0xc5   : > { %1793 = vmatprep.mubr.msk.f32.mxu0 %vm336_vm0, %v289_v27 }
  0xc8   : > { %v290_v29 = vpop.trf.xlu0  ;;  %v322_v36 = vpop.trf.xlu1 }
  0xc9   : > { %1794 = vmatmul.mubr.msk.f32.gmra.mrb[12].mxu0 %vm336_vm0, %v290_v29 }
  0xcc   : > { %v291_v31 = vpop.trf.xlu0  ;;  %v323_v37 = vpop.trf.xlu1 }
  0xcd   : > { %1796 = vmatprep.mubr.msk.f32.mxu0 %vm336_vm0, %v291_v31 }
  0xd0   : > { %v292_v32 = vpop.trf.xlu0  ;;  %v324_v40 = vpop.trf.xlu1 }
  0xd1   : > { %1797 = vmatmul.mubr.msk.f32.gmra.mrb[14].mxu0 %vm336_vm0, %v292_v32 }
  0xd2   : > { %1799 = vmatprep.mubr.msk.f32.mxu0 %vm336_vm0, %v309_v8 }
  0xd5   : > { %1800 = vmatmul.mubr.msk.f32.gmra.mrb[16].mxu0 %vm336_vm0, %v310_v10 }
  0xd6   : > { %1802 = vmatprep.mubr.msk.f32.mxu0 %vm336_vm0, %v311_v13 }
  0xd9   : > { %1803 = vmatmul.mubr.msk.f32.gmra.mrb[18].mxu0 %vm336_vm0, %v312_v15 }
  0xda   : > { %1805 = vmatprep.mubr.msk.f32.mxu0 %vm336_vm0, %v313_v18 }
  0xdd   : > { %1806 = vmatmul.mubr.msk.f32.gmra.mrb[20].mxu0 %vm336_vm0, %v314_v20 }
  0xde   : > { %1808 = vmatprep.mubr.msk.f32.mxu0 %vm336_vm0, %v315_v23 }
  0xe1   : > { %1809 = vmatmul.mubr.msk.f32.gmra.mrb[22].mxu0 %vm336_vm0, %v316_v25 }
  0xe2   : > { %1811 = vmatprep.mubr.msk.f32.mxu0 %vm336_vm0, %v317_v28 }
  0xe5   : > { %1812 = vmatmul.mubr.msk.f32.gmra.mrb[24].mxu0 %vm336_vm0, %v318_v30 }
  0xe6   : > { %1814 = vmatprep.mubr.msk.f32.mxu0 %vm336_vm0, %v319_v33 }
  0xe9   : > { %1815 = vmatmul.mubr.msk.f32.gmra.mrb[26].mxu0 %vm336_vm0, %v320_v34 }
  0xea   : > { %1817 = vmatprep.mubr.msk.f32.mxu0 %vm336_vm0, %v321_v35 }
  0xed   : > { %1818 = vmatmul.mubr.msk.f32.gmra.mrb[28].mxu0 %vm336_vm0, %v322_v36 }
  0xee   : > { %1820 = vmatprep.mubr.msk.f32.mxu0 %vm336_vm0, %v323_v37 }
  0xf1   : > { %1821 = vmatmul.mubr.msk.f32.gmra.mrb[30].mxu0 %vm336_vm0, %v324_v40 }
  0xf2   : > { %1363 = vmatprep.mubr.f32.mxu0 %v2223_v3 }
 0x16c   : > { %v1777_v43 = vpop.f32.mrb[0].mxu0 }
 0x16d   : > { %v499_v44 = vpop.f32.mrb[1].mxu0  ;;  %v505_v46 = vadd.f32 %v1777_v43, %v2276_v42 }
 0x16e   : > { %v500_v45 = vadd.f32 %v2276_v42, %v499_v44 }
 0x170   : > { %1699 = vmatmul.mubr.msk.f32.vlgmr.msra.gmra.mrb[0].mxu1 %vm336_vm0, %v500_v45 }
 0x171   : > { %824 = vmatprep.mubr.f32.mxu1 %v2675_v41 }
 0x174   : > { %v1780_v47 = vpop.f32.mrb[2].mxu0  ;;  %1700 = vmatmul.mubr.msk.f32.gmra.mrb[2].mxu1 %vm336_vm0, %v505_v46 }
 0x175   : > { %v509_v48 = vpop.f32.mrb[3].mxu0  ;;  %830 = vmatprep.mubr.f32.mxu1 %v2675_v41  ;;  %v515_v50 = vadd.f32 %v1780_v47, %v2276_v42 }
 0x176   : > { %v510_v49 = vadd.f32 %v2276_v42, %v509_v48 }
 0x178   : > { %1701 = vmatmul.mubr.msk.f32.gmra.mrb[4].mxu1 %vm336_vm0, %v510_v49 }
 0x179   : > { %836 = vmatprep.mubr.f32.mxu1 %v2675_v41 }
 0x17c   : > { %v1783_v51 = vpop.f32.mrb[4].mxu0  ;;  %1702 = vmatmul.mubr.msk.f32.gmra.mrb[6].mxu1 %vm336_vm0, %v515_v50 }
 0x17d   : > { %v519_v52 = vpop.f32.mrb[5].mxu0  ;;  %842 = vmatprep.mubr.f32.mxu1 %v2675_v41  ;;  %v525_v54 = vadd.f32 %v1783_v51, %v2276_v42 }
 0x17e   : > { %v520_v53 = vadd.f32 %v2276_v42, %v519_v52 }
 0x180   : > { %1703 = vmatmul.mubr.msk.f32.gmra.mrb[8].mxu1 %vm336_vm0, %v520_v53 }
 0x181   : > { %848 = vmatprep.mubr.f32.mxu1 %v2675_v41 }
 0x184   : > { %v1786_v55 = vpop.f32.mrb[6].mxu0  ;;  %1704 = vmatmul.mubr.msk.f32.gmra.mrb[10].mxu1 %vm336_vm0, %v525_v54 }
 0x185   : > { %v529_v56 = vpop.f32.mrb[7].mxu0  ;;  %854 = vmatprep.mubr.f32.mxu1 %v2675_v41  ;;  %v535_v58 = vadd.f32 %v1786_v55, %v2276_v42 }
 0x186   : > { %v530_v57 = vadd.f32 %v2276_v42, %v529_v56 }
 0x188   : > { %1705 = vmatmul.mubr.msk.f32.gmra.mrb[12].mxu1 %vm336_vm0, %v530_v57 }
 0x189   : > { %860 = vmatprep.mubr.f32.mxu1 %v2675_v41 }
 0x18c   : > { %v1789_v59 = vpop.f32.mrb[8].mxu0  ;;  %1706 = vmatmul.mubr.msk.f32.gmra.mrb[14].mxu1 %vm336_vm0, %v535_v58 }
 0x18d   : > { %v539_v60 = vpop.f32.mrb[9].mxu0  ;;  %866 = vmatprep.mubr.f32.mxu1 %v2675_v41  ;;  %v545_v62 = vadd.f32 %v1789_v59, %v2276_v42 }
 0x18e   : > { %v540_v61 = vadd.f32 %v2276_v42, %v539_v60 }
 0x190   : > { %1707 = vmatmul.mubr.msk.f32.gmra.mrb[16].mxu1 %vm336_vm0, %v540_v61 }
 0x191   : > { %872 = vmatprep.mubr.f32.mxu1 %v2675_v41 }
 0x194   : > { %v1792_v63 = vpop.f32.mrb[10].mxu0  ;;  %1708 = vmatmul.mubr.msk.f32.gmra.mrb[18].mxu1 %vm336_vm0, %v545_v62 }
 0x195   : > { %v549_v0 = vpop.f32.mrb[11].mxu0  ;;  %878 = vmatprep.mubr.f32.mxu1 %v2675_v41  ;;  %v555_v2 = vadd.f32 %v1792_v63, %v2276_v42 }
 0x196   : > { %v550_v1 = vadd.f32 %v2276_v42, %v549_v0 }
 0x198   : > { %1709 = vmatmul.mubr.msk.f32.gmra.mrb[20].mxu1 %vm336_vm0, %v550_v1 }
 0x199   : > { %884 = vmatprep.mubr.f32.mxu1 %v2675_v41 }
 0x19c   : > { %v1795_v3 = vpop.f32.mrb[12].mxu0  ;;  %1710 = vmatmul.mubr.msk.f32.gmra.mrb[22].mxu1 %vm336_vm0, %v555_v2 }
 0x19d   : > { %v559_v4 = vpop.f32.mrb[13].mxu0  ;;  %890 = vmatprep.mubr.f32.mxu1 %v2675_v41  ;;  %v565_v6 = vadd.f32 %v1795_v3, %v2276_v42 }
 0x19e   : > { %v560_v5 = vadd.f32 %v2276_v42, %v559_v4 }
 0x1a0   : > { %1711 = vmatmul.mubr.msk.f32.gmra.mrb[24].mxu1 %vm336_vm0, %v560_v5 }
 0x1a1   : > { %896 = vmatprep.mubr.f32.mxu1 %v2675_v41 }
 0x1a4   : > { %v1798_v7 = vpop.f32.mrb[14].mxu0  ;;  %1712 = vmatmul.mubr.msk.f32.gmra.mrb[26].mxu1 %vm336_vm0, %v565_v6 }
 0x1a5   : > { %v569_v8 = vpop.f32.mrb[15].mxu0  ;;  %902 = vmatprep.mubr.f32.mxu1 %v2675_v41  ;;  %v575_v12 = vadd.f32 %v1798_v7, %v2276_v42 }
 0x1a6   : > { %v570_v9 = vadd.f32 %v2276_v42, %v569_v8 }
 0x1a8   : > { %1713 = vmatmul.mubr.msk.f32.gmra.mrb[28].mxu1 %vm336_vm0, %v570_v9  ;;  %v1801_v10 = vpop.f32.mrb[16].mxu0 }
 0x1a9   : > { %908 = vmatprep.mubr.f32.mxu1 %v2675_v41  ;;  %v579_v11 = vpop.f32.mrb[17].mxu0  ;;  %v585_v18 = vadd.f32 %v1801_v10, %v2276_v42 }
 0x1aa   : > { %v580_v13 = vadd.f32 %v2276_v42, %v579_v11 }
 0x1ac   : > { %1714 = vmatmul.mubr.msk.f32.gmra.mrb[30].mxu1 %vm336_vm0, %v575_v12  ;;  %v1804_v14 = vpop.f32.mrb[18].mxu0 }
 0x1ad   : > { %914 = vmatprep.mubr.f32.mxu1 %v2675_v41  ;;  %v589_v15 = vpop.f32.mrb[19].mxu0  ;;  %v595_v24 = vadd.f32 %v1804_v14, %v2276_v42 }
 0x1ae   : > { %v590_v19 = vadd.f32 %v2276_v42, %v589_v15 }
 0x1b0   : > { %1715 = vmatmul.mubr.msk.f32.gmra.mrb[32].mxu1 %vm336_vm0, %v580_v13  ;;  %v1807_v16 = vpop.f32.mrb[20].mxu0 }
 0x1b1   : > { %920 = vmatprep.mubr.f32.mxu1 %v2675_v41  ;;  %v599_v17 = vpop.f32.mrb[21].mxu0  ;;  %v605_v30 = vadd.f32 %v1807_v16, %v2276_v42 }
 0x1b2   : > { %v600_v25 = vadd.f32 %v2276_v42, %v599_v17 }
 0x1b4   : > { %1716 = vmatmul.mubr.msk.f32.gmra.mrb[34].mxu1 %vm336_vm0, %v585_v18  ;;  %v1810_v20 = vpop.f32.mrb[22].mxu0 }
 0x1b5   : > { %926 = vmatprep.mubr.f32.mxu1 %v2675_v41  ;;  %v609_v21 = vpop.f32.mrb[23].mxu0  ;;  %v615_v34 = vadd.f32 %v1810_v20, %v2276_v42 }
 0x1b6   : > { %v610_v31 = vadd.f32 %v2276_v42, %v609_v21 }
 0x1b8   : > { %1717 = vmatmul.mubr.msk.f32.gmra.mrb[36].mxu1 %vm336_vm0, %v590_v19  ;;  %v1813_v22 = vpop.f32.mrb[24].mxu0 }
 0x1b9   : > { %932 = vmatprep.mubr.f32.mxu1 %v2675_v41  ;;  %v619_v23 = vpop.f32.mrb[25].mxu0  ;;  %v625_v36 = vadd.f32 %v1813_v22, %v2276_v42 }
 0x1ba   : > { %v620_v35 = vadd.f32 %v2276_v42, %v619_v23 }
 0x1bc   : > { %1718 = vmatmul.mubr.msk.f32.gmra.mrb[38].mxu1 %vm336_vm0, %v595_v24  ;;  %v1816_v26 = vpop.f32.mrb[26].mxu0 }
 0x1bd   : > { %938 = vmatprep.mubr.f32.mxu1 %v2675_v41  ;;  %v629_v27 = vpop.f32.mrb[27].mxu0  ;;  %v635_v38 = vadd.f32 %v1816_v26, %v2276_v42 }
 0x1be   : > { %v630_v37 = vadd.f32 %v2276_v42, %v629_v27 }
 0x1c0   : > { %1719 = vmatmul.mubr.msk.f32.gmra.mrb[40].mxu1 %vm336_vm0, %v600_v25  ;;  %v1819_v28 = vpop.f32.mrb[28].mxu0 }
 0x1c1   : > { %944 = vmatprep.mubr.f32.mxu1 %v2675_v41  ;;  %v639_v29 = vpop.f32.mrb[29].mxu0  ;;  %v645_v40 = vadd.f32 %v1819_v28, %v2276_v42 }
 0x1c2   : > { %v640_v39 = vadd.f32 %v2276_v42, %v639_v29 }
 0x1c4   : > { %1720 = vmatmul.mubr.msk.f32.gmra.mrb[42].mxu1 %vm336_vm0, %v605_v30  ;;  %v1822_v32 = vpop.f32.mrb[30].mxu0 }
 0x1c5   : > { %950 = vmatprep.mubr.f32.mxu1 %v2675_v41  ;;  %v649_v33 = vpop.f32.mrb[31].mxu0  ;;  %v655_v44 = vadd.f32 %v1822_v32, %v2276_v42 }
 0x1c6   : > { %v650_v43 = vadd.f32 %v2276_v42, %v649_v33 }
 0x1c8   : > { %1721 = vmatmul.mubr.msk.f32.gmra.mrb[44].mxu1 %vm336_vm0, %v610_v31 }
 0x1c9   : > { %956 = vmatprep.mubr.f32.mxu1 %v2675_v41 }
 0x1cc   : > { %1722 = vmatmul.mubr.msk.f32.gmra.mrb[46].mxu1 %vm336_vm0, %v615_v34 }
 0x1cd   : > { %962 = vmatprep.mubr.f32.mxu1 %v2675_v41 }
 0x1d0   : > { %1723 = vmatmul.mubr.msk.f32.gmra.mrb[48].mxu1 %vm336_vm0, %v620_v35 }
 0x1d1   : > { %968 = vmatprep.mubr.f32.mxu1 %v2675_v41 }
 0x1d4   : > { %1724 = vmatmul.mubr.msk.f32.gmra.mrb[50].mxu1 %vm336_vm0, %v625_v36 }
 0x1d5   : > { %974 = vmatprep.mubr.f32.mxu1 %v2675_v41 }
 0x1d8   : > { %1725 = vmatmul.mubr.msk.f32.gmra.mrb[52].mxu1 %vm336_vm0, %v630_v37 }
 0x1d9   : > { %980 = vmatprep.mubr.f32.mxu1 %v2675_v41 }
 0x1dc   : > { %1726 = vmatmul.mubr.msk.f32.gmra.mrb[54].mxu1 %vm336_vm0, %v635_v38 }
 0x1dd   : > { %986 = vmatprep.mubr.f32.mxu1 %v2675_v41 }
 0x1e0   : > { %1727 = vmatmul.mubr.msk.f32.gmra.mrb[56].mxu1 %vm336_vm0, %v640_v39 }
 0x1e1   : > { %992 = vmatprep.mubr.f32.mxu1 %v2675_v41 }
 0x1e4   : > { %1728 = vmatmul.mubr.msk.f32.gmra.mrb[58].mxu1 %vm336_vm0, %v645_v40 }
 0x1e5   : > { %998 = vmatprep.mubr.f32.mxu1 %v2675_v41 }
 0x1e8   : > { %1729 = vmatmul.mubr.msk.f32.gmra.mrb[60].mxu1 %vm336_vm0, %v650_v43 }
 0x1e9   : > { %1004 = vmatprep.mubr.f32.mxu1 %v2675_v41 }
 0x1ec   : > { %1730 = vmatmul.mubr.msk.f32.gmra.mrb[62].mxu1 %vm336_vm0, %v655_v44 }
 0x243   : > { %v2373_v45 = vpop.f32.mrb[0].mxu1 }
 0x244   : > { %v2375_v46 = vpop.f32.mrb[1].mxu1 }
 0x245   : > { %v1011_v47 = vmax.f32 %v2373_v45, %v2375_v46 }
 0x247   : > { %1012 = vmax.xlane.f32.xlu0 %v1011_v47  ;;  %v2379_v48 = vpop.f32.mrb[2].mxu1 }
 0x248   : > { %v2381_v49 = vpop.f32.mrb[3].mxu1 }
 0x249   : > { %v1014_v50 = vmax.f32 %v2379_v48, %v2381_v49 }
 0x24b   : > { %1015 = vmax.xlane.f32.xlu1 %v1014_v50  ;;  %v2385_v51 = vpop.f32.mrb[4].mxu1 }
 0x24c   : > { %v2387_v42 = vpop.f32.mrb[5].mxu1 }
 0x24d   : > { %v1017_v52 = vmax.f32 %v2385_v51, %v2387_v42 }
 0x24f   : > { %1018 = vmax.xlane.f32.xlu1 %v1017_v52  ;;  %v2391_v53 = vpop.f32.mrb[6].mxu1 }
 0x250   : > { %v2393_v54 = vpop.f32.mrb[7].mxu1 }
 0x251   : > { %v1020_v55 = vmax.f32 %v2391_v53, %v2393_v54 }
 0x253   : > { %1021 = vmax.xlane.f32.xlu1 %v1020_v55  ;;  %v2397_v56 = vpop.f32.mrb[8].mxu1 }
 0x254   : > { %v2399_v57 = vpop.f32.mrb[9].mxu1 }
 0x255   : > { %v1023_v58 = vmax.f32 %v2397_v56, %v2399_v57 }
 0x257   : > { %1024 = vmax.xlane.f32.xlu0 %v1023_v58  ;;  %v2403_v59 = vpop.f32.mrb[10].mxu1 }
 0x258   : > { %v2405_v60 = vpop.f32.mrb[11].mxu1 }
 0x259   : > { %v1026_v61 = vmax.f32 %v2403_v59, %v2405_v60 }
 0x25b   : > { %1027 = vmax.xlane.f32.xlu1 %v1026_v61  ;;  %v2409_v62 = vpop.f32.mrb[12].mxu1 }
 0x25c   : > { %v2411_v63 = vpop.f32.mrb[13].mxu1 }
 0x25d   : > { %v1029_v0 = vmax.f32 %v2409_v62, %v2411_v63 }
 0x25f   : > { %1030 = vmax.xlane.f32.xlu0 %v1029_v0  ;;  %v2415_v1 = vpop.f32.mrb[14].mxu1 }
 0x260   : > { %v2417_v2 = vpop.f32.mrb[15].mxu1 }
 0x261   : > { %v1032_v3 = vmax.f32 %v2415_v1, %v2417_v2 }
 0x263   : > { %1033 = vmax.xlane.f32.xlu1 %v1032_v3  ;;  %v2421_v4 = vpop.f32.mrb[16].mxu1 }
 0x264   : > { %v2423_v5 = vpop.f32.mrb[17].mxu1 }
 0x265   : > { %v1035_v6 = vmax.f32 %v2421_v4, %v2423_v5 }
 0x267   : > { %1036 = vmax.xlane.f32.xlu0 %v1035_v6  ;;  %v2427_v7 = vpop.f32.mrb[18].mxu1 }
 0x268   : > { %v2429_v8 = vpop.f32.mrb[19].mxu1 }
 0x269   : > { %v1038_v9 = vmax.f32 %v2427_v7, %v2429_v8 }
 0x26b   : > { %1039 = vmax.xlane.f32.xlu1 %v1038_v9  ;;  %v2433_v10 = vpop.f32.mrb[20].mxu1 }
 0x26c   : > { %v2435_v11 = vpop.f32.mrb[21].mxu1 }
 0x26d   : > { %v1041_v12 = vmax.f32 %v2433_v10, %v2435_v11 }
 0x26f   : > { %1042 = vmax.xlane.f32.xlu0 %v1041_v12  ;;  %v2439_v13 = vpop.f32.mrb[22].mxu1 }
 0x270   : > { %v2441_v14 = vpop.f32.mrb[23].mxu1 }
 0x271   : > { %v1044_v15 = vmax.f32 %v2439_v13, %v2441_v14 }
 0x273   : > { %1045 = vmax.xlane.f32.xlu1 %v1044_v15  ;;  %v2445_v16 = vpop.f32.mrb[24].mxu1 }
 0x274   : > { %v2447_v17 = vpop.f32.mrb[25].mxu1 }
 0x275   : > { %v1047_v18 = vmax.f32 %v2445_v16, %v2447_v17 }
 0x277   : > { %1048 = vmax.xlane.f32.xlu0 %v1047_v18  ;;  %v2451_v19 = vpop.f32.mrb[26].mxu1 }
 0x278   : > { %v2453_v20 = vpop.f32.mrb[27].mxu1 }
 0x279   : > { %v1050_v21 = vmax.f32 %v2451_v19, %v2453_v20 }
 0x27b   : > { %1051 = vmax.xlane.f32.xlu1 %v1050_v21  ;;  %v2457_v22 = vpop.f32.mrb[28].mxu1 }
 0x27c   : > { %v2459_v23 = vpop.f32.mrb[29].mxu1 }
 0x27d   : > { %v1053_v24 = vmax.f32 %v2457_v22, %v2459_v23 }
 0x27f   : > { %1054 = vmax.xlane.f32.xlu0 %v1053_v24  ;;  %v2463_v25 = vpop.f32.mrb[30].mxu1 }
 0x280   : > { %v2465_v26 = vpop.f32.mrb[31].mxu1 }
 0x281   : > { %v1056_v27 = vmax.f32 %v2463_v25, %v2465_v26 }
 0x283   : > { %1057 = vmax.xlane.f32.xlu1 %v1056_v27  ;;  %v2469_v28 = vpop.f32.mrb[32].mxu1 }
 0x284   : > { %v2471_v29 = vpop.f32.mrb[33].mxu1 }
 0x285   : > { %v1059_v30 = vmax.f32 %v2469_v28, %v2471_v29 }
 0x287   : > { %1060 = vmax.xlane.f32.xlu0 %v1059_v30  ;;  %v2475_v31 = vpop.f32.mrb[34].mxu1 }
 0x288   : > { %v2477_v32 = vpop.f32.mrb[35].mxu1 }
 0x289   : > { %v1062_v33 = vmax.f32 %v2475_v31, %v2477_v32 }
 0x28b   : > { %1063 = vmax.xlane.f32.xlu1 %v1062_v33  ;;  %v2481_v34 = vpop.f32.mrb[36].mxu1 }
 0x28c   : > { %v2483_v35 = vpop.f32.mrb[37].mxu1 }
 0x28d   : > { %v1065_v36 = vmax.f32 %v2481_v34, %v2483_v35 }
 0x28f   : > { %1066 = vmax.xlane.f32.xlu0 %v1065_v36  ;;  %v2487_v37 = vpop.f32.mrb[38].mxu1 }
 0x290   : > { %v2489_v38 = vpop.f32.mrb[39].mxu1 }
 0x291   : > { %v1068_v39 = vmax.f32 %v2487_v37, %v2489_v38 }
 0x293   : > { %1069 = vmax.xlane.f32.xlu1 %v1068_v39  ;;  %v2493_v40 = vpop.f32.mrb[40].mxu1 }
 0x294   : > { %v2495_v43 = vpop.f32.mrb[41].mxu1 }
 0x295   : > { %v1071_v44 = vmax.f32 %v2493_v40, %v2495_v43 }
 0x297   : > { %1072 = vmax.xlane.f32.xlu0 %v1071_v44  ;;  %v2499_v47 = vpop.f32.mrb[42].mxu1 }
 0x298   : > { %v2501_v50 = vpop.f32.mrb[43].mxu1 }
 0x299   : > { %v1074_v52 = vmax.f32 %v2499_v47, %v2501_v50 }
 0x29b   : > { %1075 = vmax.xlane.f32.xlu1 %v1074_v52  ;;  %v2505_v55 = vpop.f32.mrb[44].mxu1 }
 0x29c   : > { %v2507_v58 = vpop.f32.mrb[45].mxu1 }
 0x29d   : > { %v1077_v61 = vmax.f32 %v2505_v55, %v2507_v58 }
 0x29f   : > { %1078 = vmax.xlane.f32.xlu0 %v1077_v61  ;;  %v2511_v0 = vpop.f32.mrb[46].mxu1 }
 0x2a0   : > { %v2513_v3 = vpop.f32.mrb[47].mxu1 }
 0x2a1   : > { %v1080_v6 = vmax.f32 %v2511_v0, %v2513_v3 }
 0x2a3   : > { %1081 = vmax.xlane.f32.xlu1 %v1080_v6  ;;  %v2517_v9 = vpop.f32.mrb[48].mxu1 }
 0x2a4   : > { %v2519_v12 = vpop.f32.mrb[49].mxu1 }
 0x2a5   : > { %v1083_v15 = vmax.f32 %v2517_v9, %v2519_v12 }
 0x2a7   : > { %1084 = vmax.xlane.f32.xlu0 %v1083_v15  ;;  %v2523_v18 = vpop.f32.mrb[50].mxu1 }
 0x2a8   : > { %2690 = vst [vmem:[#allocation2_spill] sm:$0xff] %v2523_v18  ;;  %v2525_v21 = vpop.f32.mrb[51].mxu1 }
 0x2a9   : > { %2691 = vst [vmem:[#allocation3_spill] sm:$0xff] %v2525_v21  ;;  %v1086_v24 = vmax.f32 %v2523_v18, %v2525_v21 }
 0x2ab   : > { %1087 = vmax.xlane.f32.xlu1 %v1086_v24  ;;  %v2529_v27 = vpop.f32.mrb[52].mxu1 }
 0x2ac   : > { %2692 = vst [vmem:[#allocation4_spill] sm:$0xff] %v2529_v27  ;;  %v2531_v30 = vpop.f32.mrb[53].mxu1 }
 0x2ad   : > { %2693 = vst [vmem:[#allocation5_spill] sm:$0xff] %v2531_v30  ;;  %v1089_v33 = vmax.f32 %v2529_v27, %v2531_v30 }
 0x2af   : > { %1090 = vmax.xlane.f32.xlu0 %v1089_v33  ;;  %v2535_v36 = vpop.f32.mrb[54].mxu1 }
 0x2b0   : > { %2694 = vst [vmem:[#allocation6_spill] sm:$0xff] %v2535_v36  ;;  %v2537_v39 = vpop.f32.mrb[55].mxu1 }
 0x2b1   : > { %2695 = vst [vmem:[#allocation7_spill] sm:$0xff] %v2537_v39  ;;  %v1092_v44 = vmax.f32 %v2535_v36, %v2537_v39 }
 0x2b3   : > { %1093 = vmax.xlane.f32.xlu1 %v1092_v44  ;;  %v2541_v52 = vpop.f32.mrb[56].mxu1 }
 0x2b4   : > { %2696 = vst [vmem:[#allocation8_spill] sm:$0xff] %v2541_v52  ;;  %v2543_v61 = vpop.f32.mrb[57].mxu1 }
 0x2b5   : > { %2697 = vst [vmem:[#allocation9_spill] sm:$0xff] %v2543_v61  ;;  %v1095_v6 = vmax.f32 %v2541_v52, %v2543_v61 }
 0x2b7   : > { %1096 = vmax.xlane.f32.xlu0 %v1095_v6  ;;  %v2547_v15 = vpop.f32.mrb[58].mxu1 }
 0x2b8   : > { %2698 = vst [vmem:[#allocation10_spill] sm:$0xff] %v2547_v15  ;;  %v2549_v24 = vpop.f32.mrb[59].mxu1 }
 0x2b9   : > { %2699 = vst [vmem:[#allocation11_spill] sm:$0xff] %v2549_v24  ;;  %v1098_v33 = vmax.f32 %v2547_v15, %v2549_v24 }
 0x2bb   : > { %1099 = vmax.xlane.f32.xlu1 %v1098_v33  ;;  %v2553_v41 = vpop.f32.mrb[60].mxu1 }
 0x2bc   : > { %2700 = vst [vmem:[#allocation12_spill] sm:$0xff] %v2553_v41  ;;  %v2555_v39 = vpop.f32.mrb[61].mxu1 }
 0x2bd   : > { %2701 = vst [vmem:[#allocation13_spill] sm:$0xff] %v2555_v39  ;;  %v1101_v44 = vmax.f32 %v2553_v41, %v2555_v39 }
 0x2bf   : > { %1102 = vmax.xlane.f32.xlu0 %v1101_v44  ;;  %v2559_v36 = vpop.f32.mrb[62].mxu1 }
 0x2c0   : > { %v2561_v61 = vpop.f32.mrb[63].mxu1 }
 0x2c1   : > { %2702 = vst [vmem:[#allocation14_spill] sm:$0xff] %v2561_v61  ;;  %v1104_v6 = vmax.f32 %v2559_v36, %v2561_v61 }
 0x2c3   : > { %1105 = vmax.xlane.f32.xlu1 %v1104_v6 }
 0x2d4   : > { %v1013_v52 = vpop.xlane.xlu0 %1012 }
 0x2d5   : > { %v1107_v24 = vsub.f32 %v2373_v45, %v1013_v52  ;;  %v1108_v33 = vsub.f32 %v2375_v46, %v1013_v52 }
 0x2d7   : > { %v1171_v15 = vmul.f32 1.442695, %v1107_v24  ;;  %v1173_v30 = vmul.f32 1.442695, %v1108_v33 }
 0x2d8   : > { %v1016_v27 = vpop.xlane.xlu1 %1015 }
 0x2d9   : > { %v1109_v21 = vsub.f32 %v2379_v48, %v1016_v27  ;;  %v1110_v44 = vsub.f32 %v2381_v49, %v1016_v27  ;;  %1992 = vpow2.f32 %v1171_v15 }
 0x2da   : > { %1994 = vpow2.f32 %v1173_v30 }
 0x2db   : > { %v1175_v39 = vmul.f32 1.442695, %v1109_v21  ;;  %v1177_v41 = vmul.f32 1.442695, %v1110_v44 }
 0x2dc   : > { %v1019_v18 = vpop.xlane.xlu1 %1018 }
 0x2dd   : > { %1996 = vpow2.f32 %v1175_v39  ;;  %v1111_v6 = vsub.f32 %v2385_v51, %v1019_v18  ;;  %v1112_v61 = vsub.f32 %v2387_v42, %v1019_v18 }
 0x2de   : > { %1998 = vpow2.f32 %v1177_v41 }
 0x2df   : > { %v1179_v45 = vmul.f32 1.442695, %v1111_v6  ;;  %v1181_v46 = vmul.f32 1.442695, %v1112_v61 }
 0x2e0   : > { %v1022_v52 = vpop.xlane.xlu1 %1021 }
 0x2e1   : > { %v1113_v24 = vsub.f32 %v2391_v53, %v1022_v52  ;;  %v1114_v48 = vsub.f32 %v2393_v54, %v1022_v52  ;;  %2000 = vpow2.f32 %v1179_v45 }
 0x2e2   : > { %2002 = vpow2.f32 %v1181_v46 }
 0x2e3   : > { %v1183_v49 = vmul.f32 1.442695, %v1113_v24  ;;  %v1185_v27 = vmul.f32 1.442695, %v1114_v48  ;;  %v1993_v30 = vpop.eup %1992 }
 0x2e4   : > { %v1025_v21 = vpop.xlane.xlu0 %1024  ;;  %v1995_v42 = vpop.eup %1994 }
 0x2e5   : > { %2004 = vpow2.f32 %v1183_v49  ;;  %v1115_v39 = vsub.f32 %v2397_v56, %v1025_v21  ;;  %v1116_v51 = vsub.f32 %v2399_v57, %v1025_v21 }
 0x2e6   : > { %2006 = vpow2.f32 %v1185_v27 }
 0x2e7   : > { %v1997_v41 = vpop.eup %1996  ;;  %v1187_v18 = vmul.f32 1.442695, %v1115_v39  ;;  %v1189_v15 = vmul.f32 1.442695, %v1116_v51  ;;  %v2153_v39 = vmov 1.0  }
 0x2e8   : > { %v1999_v61 = vpop.eup %1998  ;;  %v1028_v53 = vpop.xlane.xlu1 %1027  ;;  %v1833_v33 = vpack.c.bf16 %v1997_v41, %v1993_v30  ;;  %1440 = vmatprep.mubr.f32.mxu1 %v2153_v39 }
 0x2e9   : > { %v1117_v54 = vsub.f32 %v2403_v59, %v1028_v53  ;;  %v1118_v44 = vsub.f32 %v2405_v60, %v1028_v53  ;;  %v1831_v6 = vpack.c.bf16 %v1999_v61, %v1995_v42  ;;  %2008 = vpow2.f32 %v1187_v18 }
 0x2ea   : > { %2010 = vpow2.f32 %v1189_v15 }
 0x2eb   : > { %v1191_v45 = vmul.f32 1.442695, %v1117_v54  ;;  %v1193_v46 = vmul.f32 1.442695, %v1118_v44  ;;  %1832 = vmatprep.subr.bf16.mxu0 %v1831_v6  ;;  %1896 = vmatprep.subr.bf16.mxu1 %v1831_v6  ;;  %v2001_v57 = vpop.eup %2000 }
 0x2ec   : > { %1834 = vmatpush1.bf16.xpose.msra.mxu0 %v1833_v33  ;;  %1898 = vmatpush1.bf16.xpose.msra.mxu1 %v1833_v33  ;;  %v1031_v56 = vpop.xlane.xlu0 %1030  ;;  %v2003_v48 = vpop.eup %2002 }
 0x2ed   : > { %2012 = vpow2.f32 %v1191_v45  ;;  %v1119_v52 = vsub.f32 %v2409_v62, %v1031_v56  ;;  %v1120_v24 = vsub.f32 %v2411_v63, %v1031_v56 }
 0x2ee   : > { %2014 = vpow2.f32 %v1193_v46 }
 0x2ef   : > { %v2005_v59 = vpop.eup %2004  ;;  %v1195_v60 = vmul.f32 1.442695, %v1119_v52  ;;  %v1197_v27 = vmul.f32 1.442695, %v1120_v24 }
 0x2f0   : > { %v2007_v49 = vpop.eup %2006  ;;  %v1034_v21 = vpop.xlane.xlu1 %1033  ;;  %v1837_v30 = vpack.c.bf16 %v2005_v59, %v2001_v57 }
 0x2f1   : > { %v1121_v51 = vsub.f32 %v2415_v1, %v1034_v21  ;;  %v1122_v42 = vsub.f32 %v2417_v2, %v1034_v21  ;;  %v1835_v41 = vpack.c.bf16 %v2007_v49, %v2003_v48  ;;  %2016 = vpow2.f32 %v1195_v60 }
 0x2f2   : > { %2018 = vpow2.f32 %v1197_v27 }
 0x2f3   : > { %v1199_v62 = vmul.f32 1.442695, %v1121_v51  ;;  %v1201_v18 = vmul.f32 1.442695, %v1122_v42  ;;  %1836 = vmatprep.subr.bf16.mxu0 %v1835_v41  ;;  %1900 = vmatprep.subr.bf16.mxu1 %v1835_v41  ;;  %v2009_v61 = vpop.eup %2008 }
 0x2f4   : > { %1838 = vmatpush1.bf16.xpose.msra.mxu0 %v1837_v30  ;;  %1902 = vmatpush1.bf16.xpose.msra.mxu1 %v1837_v30  ;;  %v1037_v63 = vpop.xlane.xlu0 %1036  ;;  %v2011_v33 = vpop.eup %2010 }
 0x2f5   : > { %2020 = vpow2.f32 %v1199_v62  ;;  %v1123_v15 = vsub.f32 %v2421_v4, %v1037_v63  ;;  %v1124_v53 = vsub.f32 %v2423_v5, %v1037_v63 }
 0x2f6   : > { %2022 = vpow2.f32 %v1201_v18 }
 0x2f7   : > { %v2013_v1 = vpop.eup %2012  ;;  %v1203_v2 = vmul.f32 1.442695, %v1123_v15  ;;  %v1205_v44 = vmul.f32 1.442695, %v1124_v53 }
 0x2f8   : > { %v2015_v54 = vpop.eup %2014  ;;  %v1040_v6 = vpop.xlane.xlu1 %1039  ;;  %v1841_v45 = vpack.c.bf16 %v2013_v1, %v2009_v61 }
 0x2f9   : > { %v1125_v46 = vsub.f32 %v2427_v7, %v1040_v6  ;;  %v1126_v56 = vsub.f32 %v2429_v8, %v1040_v6  ;;  %v1839_v57 = vpack.c.bf16 %v2015_v54, %v2011_v33  ;;  %2024 = vpow2.f32 %v1203_v2 }
 0x2fa   : > { %2026 = vpow2.f32 %v1205_v44 }
 0x2fb   : > { %v1207_v52 = vmul.f32 1.442695, %v1125_v46  ;;  %v1209_v24 = vmul.f32 1.442695, %v1126_v56  ;;  %1840 = vmatprep.subr.bf16.mxu0 %v1839_v57  ;;  %1904 = vmatprep.subr.bf16.mxu1 %v1839_v57  ;;  %v2017_v5 = vpop.eup %2016 }
 0x2fc   : > { %1842 = vmatpush1.bf16.xpose.msra.mxu0 %v1841_v45  ;;  %1906 = vmatpush1.bf16.xpose.msra.mxu1 %v1841_v45  ;;  %v1043_v4 = vpop.xlane.xlu0 %1042  ;;  %v2019_v60 = vpop.eup %2018 }
 0x2fd   : > { %2028 = vpow2.f32 %v1207_v52  ;;  %v1127_v48 = vsub.f32 %v2433_v10, %v1043_v4  ;;  %v1128_v59 = vsub.f32 %v2435_v11, %v1043_v4 }
 0x2fe   : > { %2030 = vpow2.f32 %v1209_v24 }
 0x2ff   : > { %v2021_v7 = vpop.eup %2020  ;;  %v1211_v8 = vmul.f32 1.442695, %v1127_v48  ;;  %v1213_v27 = vmul.f32 1.442695, %v1128_v59 }
 0x300   : > { %v2023_v49 = vpop.eup %2022  ;;  %v1046_v21 = vpop.xlane.xlu1 %1045  ;;  %v1845_v30 = vpack.c.bf16 %v2021_v7, %v2017_v5 }
 0x301   : > { %v1129_v51 = vsub.f32 %v2439_v13, %v1046_v21  ;;  %v1130_v42 = vsub.f32 %v2441_v14, %v1046_v21  ;;  %v1843_v41 = vpack.c.bf16 %v2023_v49, %v2019_v60  ;;  %2032 = vpow2.f32 %v1211_v8 }
 0x302   : > { %2034 = vpow2.f32 %v1213_v27 }
 0x303   : > { %v1215_v62 = vmul.f32 1.442695, %v1129_v51  ;;  %v1217_v18 = vmul.f32 1.442695, %v1130_v42  ;;  %1844 = vmatprep.subr.bf16.mxu0 %v1843_v41  ;;  %1908 = vmatprep.subr.bf16.mxu1 %v1843_v41  ;;  %v2025_v11 = vpop.eup %2024 }
 0x304   : > { %1846 = vmatpush1.bf16.xpose.msra.mxu0 %v1845_v30  ;;  %1910 = vmatpush1.bf16.xpose.msra.mxu1 %v1845_v30  ;;  %v1049_v10 = vpop.xlane.xlu0 %1048  ;;  %v2027_v15 = vpop.eup %2026 }
 0x305   : > { %2036 = vpow2.f32 %v1215_v62  ;;  %v1131_v63 = vsub.f32 %v2445_v16, %v1049_v10  ;;  %v1132_v61 = vsub.f32 %v2447_v17, %v1049_v10 }
 0x306   : > { %2038 = vpow2.f32 %v1217_v18 }
 0x307   : > { %v2029_v13 = vpop.eup %2028  ;;  %v1219_v14 = vmul.f32 1.442695, %v1131_v63  ;;  %v1221_v33 = vmul.f32 1.442695, %v1132_v61 }
 0x308   : > { %v2031_v53 = vpop.eup %2030  ;;  %v1052_v1 = vpop.xlane.xlu1 %1051  ;;  %v1849_v2 = vpack.c.bf16 %v2029_v13, %v2025_v11 }
 0x309   : > { %v1133_v54 = vsub.f32 %v2451_v19, %v1052_v1  ;;  %v1134_v44 = vsub.f32 %v2453_v20, %v1052_v1  ;;  %v1847_v6 = vpack.c.bf16 %v2031_v53, %v2027_v15  ;;  %2040 = vpow2.f32 %v1219_v14 }
 0x30a   : > { %2042 = vpow2.f32 %v1221_v33 }
 0x30b   : > { %v1223_v45 = vmul.f32 1.442695, %v1133_v54  ;;  %v1225_v46 = vmul.f32 1.442695, %v1134_v44  ;;  %1848 = vmatprep.subr.bf16.mxu0 %v1847_v6  ;;  %1912 = vmatprep.subr.bf16.mxu1 %v1847_v6  ;;  %v2033_v17 = vpop.eup %2032 }
 0x30c   : > { %1850 = vmatpush1.bf16.xpose.msra.mxu0 %v1849_v2  ;;  %1914 = vmatpush1.bf16.xpose.msra.mxu1 %v1849_v2  ;;  %v1055_v16 = vpop.xlane.xlu0 %1054  ;;  %v2035_v52 = vpop.eup %2034 }
 0x30d   : > { %2044 = vpow2.f32 %v1223_v45  ;;  %v1135_v56 = vsub.f32 %v2457_v22, %v1055_v16  ;;  %v1136_v57 = vsub.f32 %v2459_v23, %v1055_v16 }
 0x30e   : > { %2046 = vpow2.f32 %v1225_v46 }
 0x30f   : > { %v2037_v19 = vpop.eup %2036  ;;  %v1227_v20 = vmul.f32 1.442695, %v1135_v56  ;;  %v1229_v4 = vmul.f32 1.442695, %v1136_v57 }
 0x310   : > { %v2039_v24 = vpop.eup %2038  ;;  %v1058_v5 = vpop.xlane.xlu1 %1057  ;;  %v1853_v48 = vpack.c.bf16 %v2037_v19, %v2033_v17 }
 0x311   : > { %v1137_v59 = vsub.f32 %v2463_v25, %v1058_v5  ;;  %v1138_v60 = vsub.f32 %v2465_v26, %v1058_v5  ;;  %v1851_v7 = vpack.c.bf16 %v2039_v24, %v2035_v52  ;;  %2048 = vpow2.f32 %v1227_v20 }
 0x312   : > { %2050 = vpow2.f32 %v1229_v4 }
 0x313   : > { %v1231_v8 = vmul.f32 1.442695, %v1137_v59  ;;  %v1233_v49 = vmul.f32 1.442695, %v1138_v60  ;;  %1852 = vmatprep.subr.bf16.mxu0 %v1851_v7  ;;  %1916 = vmatprep.subr.bf16.mxu1 %v1851_v7  ;;  %v2041_v23 = vpop.eup %2040 }
 0x314   : > { %1854 = vmatpush1.bf16.xpose.msra.mxu0 %v1853_v48  ;;  %1918 = vmatpush1.bf16.xpose.msra.mxu1 %v1853_v48  ;;  %v1061_v22 = vpop.xlane.xlu0 %1060  ;;  %v2043_v30 = vpop.eup %2042 }
 0x315   : > { %2052 = vpow2.f32 %v1231_v8  ;;  %v1139_v27 = vsub.f32 %v2469_v28, %v1061_v22  ;;  %v1140_v21 = vsub.f32 %v2471_v29, %v1061_v22 }
 0x316   : > { %2054 = vpow2.f32 %v1233_v49 }
 0x317   : > { %v2045_v25 = vpop.eup %2044  ;;  %v1235_v26 = vmul.f32 1.442695, %v1139_v27  ;;  %v1237_v42 = vmul.f32 1.442695, %v1140_v21 }
 0x318   : > { %v2047_v51 = vpop.eup %2046  ;;  %v1064_v41 = vpop.xlane.xlu1 %1063  ;;  %v1857_v62 = vpack.c.bf16 %v2045_v25, %v2041_v23 }
 0x319   : > { %v1141_v18 = vsub.f32 %v2475_v31, %v1064_v41  ;;  %v1142_v10 = vsub.f32 %v2477_v32, %v1064_v41  ;;  %v1855_v11 = vpack.c.bf16 %v2047_v51, %v2043_v30  ;;  %2056 = vpow2.f32 %v1235_v26 }
 0x31a   : > { %2058 = vpow2.f32 %v1237_v42 }
 0x31b   : > { %v1239_v63 = vmul.f32 1.442695, %v1141_v18  ;;  %v1241_v61 = vmul.f32 1.442695, %v1142_v10  ;;  %1856 = vmatprep.subr.bf16.mxu0 %v1855_v11  ;;  %1920 = vmatprep.subr.bf16.mxu1 %v1855_v11  ;;  %v2049_v29 = vpop.eup %2048 }
 0x31c   : > { %1858 = vmatpush1.bf16.xpose.msra.mxu0 %v1857_v62  ;;  %1922 = vmatpush1.bf16.xpose.msra.mxu1 %v1857_v62  ;;  %v1067_v28 = vpop.xlane.xlu0 %1066  ;;  %v2051_v14 = vpop.eup %2050 }
 0x31d   : > { %2060 = vpow2.f32 %v1239_v63  ;;  %v1143_v15 = vsub.f32 %v2481_v34, %v1067_v28  ;;  %v1144_v13 = vsub.f32 %v2483_v35, %v1067_v28 }
 0x31e   : > { %2062 = vpow2.f32 %v1241_v61  ;;  %v2703_v61 = vld [vmem:[#allocation2_spill] sm:$0xff] }
 0x31f   : > { %v2053_v31 = vpop.eup %2052  ;;  %v1243_v32 = vmul.f32 1.442695, %v1143_v15  ;;  %v1245_v33 = vmul.f32 1.442695, %v1144_v13 }
 0x320   : > { %v2055_v53 = vpop.eup %2054  ;;  %v1070_v1 = vpop.xlane.xlu1 %1069  ;;  %v1861_v2 = vpack.c.bf16 %v2053_v31, %v2049_v29  ;;  %v2704_v29 = vld [vmem:[#allocation3_spill] sm:$0xff] }
 0x321   : > { %v1145_v54 = vsub.f32 %v2487_v37, %v1070_v1  ;;  %v1146_v44 = vsub.f32 %v2489_v38, %v1070_v1  ;;  %v1859_v6 = vpack.c.bf16 %v2055_v53, %v2051_v14  ;;  %2064 = vpow2.f32 %v1243_v32  ;;  %v2705_v32 = vld [vmem:[#allocation4_spill] sm:$0xff] }
 0x322   : > { %2066 = vpow2.f32 %v1245_v33  ;;  %v2706_v33 = vld [vmem:[#allocation5_spill] sm:$0xff] }
 0x323   : > { %v1247_v45 = vmul.f32 1.442695, %v1145_v54  ;;  %v1249_v46 = vmul.f32 1.442695, %v1146_v44  ;;  %1860 = vmatprep.subr.bf16.mxu0 %v1859_v6  ;;  %1924 = vmatprep.subr.bf16.mxu1 %v1859_v6  ;;  %v2057_v35 = vpop.eup %2056 }
 0x324   : > { %1862 = vmatpush1.bf16.xpose.msra.mxu0 %v1861_v2  ;;  %1926 = vmatpush1.bf16.xpose.msra.mxu1 %v1861_v2  ;;  %v1073_v34 = vpop.xlane.xlu0 %1072  ;;  %v2059_v56 = vpop.eup %2058 }
 0x325   : > { %2068 = vpow2.f32 %v1247_v45  ;;  %v1147_v16 = vsub.f32 %v2493_v40, %v1073_v34  ;;  %v1148_v17 = vsub.f32 %v2495_v43, %v1073_v34 }
 0x326   : > { %2070 = vpow2.f32 %v1249_v46 }
 0x327   : > { %v2061_v37 = vpop.eup %2060  ;;  %v1251_v38 = vmul.f32 1.442695, %v1147_v16  ;;  %v1253_v52 = vmul.f32 1.442695, %v1148_v17  ;;  %v2708_v17 = vld [vmem:[#allocation7_spill] sm:$0xff] }
 0x328   : > { %v2063_v57 = vpop.eup %2062  ;;  %v1076_v19 = vpop.xlane.xlu1 %1075  ;;  %v1865_v20 = vpack.c.bf16 %v2061_v37, %v2057_v35  ;;  %v2707_v35 = vld [vmem:[#allocation6_spill] sm:$0xff] }
 0x329   : > { %v1149_v24 = vsub.f32 %v2499_v47, %v1076_v19  ;;  %v1150_v4 = vsub.f32 %v2501_v50, %v1076_v19  ;;  %v1863_v5 = vpack.c.bf16 %v2063_v57, %v2059_v56  ;;  %2072 = vpow2.f32 %v1251_v38 }
 0x32a   : > { %2074 = vpow2.f32 %v1253_v52 }
 0x32b   : > { %v1255_v48 = vmul.f32 1.442695, %v1149_v24  ;;  %v1257_v59 = vmul.f32 1.442695, %v1150_v4  ;;  %1864 = vmatprep.subr.bf16.mxu0 %v1863_v5  ;;  %1928 = vmatprep.subr.bf16.mxu1 %v1863_v5  ;;  %v2065_v43 = vpop.eup %2064  ;;  %v2710_v4 = vld [vmem:[#allocation9_spill] sm:$0xff] }
 0x32c   : > { %1866 = vmatpush1.bf16.xpose.msra.mxu0 %v1865_v20  ;;  %1930 = vmatpush1.bf16.xpose.msra.mxu1 %v1865_v20  ;;  %v1079_v40 = vpop.xlane.xlu0 %1078  ;;  %v2067_v8 = vpop.eup %2066  ;;  %v2709_v20 = vld [vmem:[#allocation8_spill] sm:$0xff] }
 0x32d   : > { %2076 = vpow2.f32 %v1255_v48  ;;  %v1151_v60 = vsub.f32 %v2505_v55, %v1079_v40  ;;  %v1152_v7 = vsub.f32 %v2507_v58, %v1079_v40 }
 0x32e   : > { %2078 = vpow2.f32 %v1257_v59 }
 0x32f   : > { %v2069_v47 = vpop.eup %2068  ;;  %v1259_v50 = vmul.f32 1.442695, %v1151_v60  ;;  %v1261_v22 = vmul.f32 1.442695, %v1152_v7 }
 0x330   : > { %v2071_v49 = vpop.eup %2070  ;;  %v1082_v23 = vpop.xlane.xlu1 %1081  ;;  %v1869_v27 = vpack.c.bf16 %v2069_v47, %v2065_v43  ;;  %v2711_v47 = vld [vmem:[#allocation10_spill] sm:$0xff] }
 0x331   : > { %v1153_v21 = vsub.f32 %v2511_v0, %v1082_v23  ;;  %v1154_v30 = vsub.f32 %v2513_v3, %v1082_v23  ;;  %v1867_v25 = vpack.c.bf16 %v2071_v49, %v2067_v8  ;;  %2080 = vpow2.f32 %v1259_v50  ;;  %v2712_v49 = vld [vmem:[#allocation11_spill] sm:$0xff] }
 0x332   : > { %2082 = vpow2.f32 %v1261_v22 }
 0x333   : > { %v1263_v26 = vmul.f32 1.442695, %v1153_v21  ;;  %v1265_v51 = vmul.f32 1.442695, %v1154_v30  ;;  %1868 = vmatprep.subr.bf16.mxu0 %v1867_v25  ;;  %1932 = vmatprep.subr.bf16.mxu1 %v1867_v25  ;;  %v2073_v58 = vpop.eup %2072 }
 0x334   : > { %1870 = vmatpush1.bf16.xpose.msra.mxu0 %v1869_v27  ;;  %1934 = vmatpush1.bf16.xpose.msra.mxu1 %v1869_v27  ;;  %v1085_v55 = vpop.xlane.xlu0 %1084  ;;  %v2075_v62 = vpop.eup %2074 }
 0x335   : > { %2084 = vpow2.f32 %v1263_v26  ;;  %v1155_v42 = vsub.f32 %v2517_v9, %v1085_v55  ;;  %v1156_v41 = vsub.f32 %v2519_v12, %v1085_v55  ;;  %v2713_v26 = vld [vmem:[#allocation12_spill] sm:$0xff]  ;;  %v2714_v55 = vld [vmem:[#allocation13_spill] sm:$0xff] }
 0x336   : > { %2086 = vpow2.f32 %v1265_v51 }
 0x337   : > { %v2077_v0 = vpop.eup %2076  ;;  %v1267_v3 = vmul.f32 1.442695, %v1155_v42  ;;  %v1269_v10 = vmul.f32 1.442695, %v1156_v41 }
 0x338   : > { %v2079_v18 = vpop.eup %2078  ;;  %v1088_v11 = vpop.xlane.xlu1 %1087  ;;  %v1873_v63 = vpack.c.bf16 %v2077_v0, %v2073_v58 }
 0x339   : > { %v1157_v28 = vsub.f32 %v2703_v61, %v1088_v11  ;;  %v1158_v15 = vsub.f32 %v2704_v29, %v1088_v11  ;;  %v1871_v13 = vpack.c.bf16 %v2079_v18, %v2075_v62  ;;  %2088 = vpow2.f32 %v1267_v3 }
 0x33a   : > { %2090 = vpow2.f32 %v1269_v10 }
 0x33b   : > { %v1271_v14 = vmul.f32 1.442695, %v1157_v28  ;;  %v1273_v31 = vmul.f32 1.442695, %v1158_v15  ;;  %1872 = vmatprep.subr.bf16.mxu0 %v1871_v13  ;;  %1936 = vmatprep.subr.bf16.mxu1 %v1871_v13  ;;  %v2081_v12 = vpop.eup %2080 }
 0x33c   : > { %1874 = vmatpush1.bf16.xpose.msra.mxu0 %v1873_v63  ;;  %1938 = vmatpush1.bf16.xpose.msra.mxu1 %v1873_v63  ;;  %v1091_v9 = vpop.xlane.xlu0 %1090  ;;  %v2083_v2 = vpop.eup %2082  ;;  %v2715_v63 = vld [vmem:[#allocation14_spill] sm:$0xff] }
 0x33d   : > { %2092 = vpow2.f32 %v1271_v14  ;;  %v1159_v53 = vsub.f32 %v2705_v32, %v1091_v9  ;;  %v1160_v1 = vsub.f32 %v2706_v33, %v1091_v9 }
 0x33e   : > { %2094 = vpow2.f32 %v1273_v31 }
 0x33f   : > { %v2085_v54 = vpop.eup %2084  ;;  %v1275_v44 = vmul.f32 1.442695, %v1159_v53  ;;  %v1277_v45 = vmul.f32 1.442695, %v1160_v1 }
 0x340   : > { %v2087_v6 = vpop.eup %2086  ;;  %v1094_v46 = vpop.xlane.xlu1 %1093  ;;  %v1877_v34 = vpack.c.bf16 %v2085_v54, %v2081_v12 }
 0x341   : > { %v1161_v16 = vsub.f32 %v2707_v35, %v1094_v46  ;;  %v1162_v56 = vsub.f32 %v2708_v17, %v1094_v46  ;;  %v1875_v37 = vpack.c.bf16 %v2087_v6, %v2083_v2  ;;  %2096 = vpow2.f32 %v1275_v44  ;;  %v2124_v44 = vld [vmem:[%s2211_s25] sm:$0xff]  ;;  %v2633_v6 = vld [vmem:[%s2211_s25 + $0x18] sm:$0xff]  ;;  %v2126_v46 = vld [vmem:[%s2211_s25 + $0x10] sm:$0xff] }
 0x342   : > { %2098 = vpow2.f32 %v1277_v45  ;;  %v2716_v45 = vmov 0.0   ;;  %v1551_v35 = vld [vmem:[%s2673_s4 + $0x8] sm:$0xff] }
 0x343   : > { %v1279_v38 = vmul.f32 1.442695, %v1161_v16  ;;  %v1281_v57 = vmul.f32 1.442695, %v1162_v56  ;;  %1876 = vmatprep.subr.bf16.mxu0 %v1875_v37  ;;  %1940 = vmatprep.subr.bf16.mxu1 %v1875_v37  ;;  %v2089_v19 = vpop.eup %2088  ;;  %v2154_v16 = vmov 0  }
 0x344   : > { %1878 = vmatpush1.bf16.xpose.msra.mxu0 %v1877_v34  ;;  %1942 = vmatpush1.bf16.xpose.msra.mxu1 %v1877_v34  ;;  %v1097_v52 = vpop.xlane.xlu0 %1096  ;;  %v2091_v48 = vpop.eup %2090  ;;  %v1550_v34 = vld [vmem:[%s2673_s4] sm:$0xff] }
 0x345   : > { %2100 = vpow2.f32 %v1279_v38  ;;  %v1163_v24 = vsub.f32 %v2709_v20, %v1097_v52  ;;  %v1164_v5 = vsub.f32 %v2710_v4, %v1097_v52  ;;  %1990 = vset.pattern.permute.xlu0 %v2154_v16  ;;  %1991 = vset.pattern.permute.xlu1 %v2154_v16  ;;  %v327_v20 = vld [vmem:[%s2672_s3] sm:$0xff] }
 0x346   : > { %2102 = vpow2.f32 %v1281_v57  ;;  %1554 = vperm.xlu0 %1990, %v1550_v34   ;;  %1559 = vperm.xlu1 %1991, %v1551_v35  }
 0x347   : > { %v2093_v59 = vpop.eup %2092  ;;  %v1283_v40 = vmul.f32 1.442695, %v1163_v24  ;;  %v1285_v60 = vmul.f32 1.442695, %v1164_v5  ;;  %v328_v24 = vld [vmem:[%s2672_s3 + $0x8] sm:$0xff] }
 0x348   : > { %v2095_v43 = vpop.eup %2094  ;;  %v1100_v7 = vpop.xlane.xlu1 %1099  ;;  %v1881_v8 = vpack.c.bf16 %v2093_v59, %v2089_v19  ;;  %v1538_v59 = vlaneseq }
 0x349   : > { %v1165_v50 = vsub.f32 %v2711_v47, %v1100_v7  ;;  %v1166_v22 = vsub.f32 %v2712_v49, %v1100_v7  ;;  %v1879_v23 = vpack.c.bf16 %v2095_v43, %v2091_v48  ;;  %2104 = vpow2.f32 %v1283_v40 }
 0x34a   : > { %2106 = vpow2.f32 %v1285_v60  ;;  %v1539_v60 = vshrl.u32 %v1538_v59, 7 }
 0x34b   : > { %v1287_v27 = vmul.f32 1.442695, %v1165_v50  ;;  %v1289_v21 = vmul.f32 1.442695, %v1166_v22  ;;  %1880 = vmatprep.subr.bf16.mxu0 %v1879_v23  ;;  %1944 = vmatprep.subr.bf16.mxu1 %v1879_v23  ;;  %v2097_v25 = vpop.eup %2096 }
 0x34c   : > { %1882 = vmatpush1.bf16.xpose.msra.mxu0 %v1881_v8  ;;  %1946 = vmatpush1.bf16.xpose.msra.mxu1 %v1881_v8  ;;  %v1103_v30 = vpop.xlane.xlu0 %1102  ;;  %v2099_v42 = vpop.eup %2098  ;;  %v1540_v47 = vsub.s32 0, %v1539_v60 }
 0x34d   : > { %2108 = vpow2.f32 %v1287_v27  ;;  %v1167_v51 = vsub.f32 %v2713_v26, %v1103_v30  ;;  %v1168_v58 = vsub.f32 %v2714_v55, %v1103_v30 }
 0x34e   : > { %2110 = vpow2.f32 %v1289_v21 }
 0x34f   : > { %v2101_v41 = vpop.eup %2100  ;;  %v1291_v62 = vmul.f32 1.442695, %v1167_v51  ;;  %v1293_v3 = vmul.f32 1.442695, %v1168_v58 }
 0x350   : > { %v2103_v0 = vpop.eup %2102  ;;  %v1106_v18 = vpop.xlane.xlu1 %1105  ;;  %v1885_v10 = vpack.c.bf16 %v2101_v41, %v2097_v25 }
 0x351   : > { %v1169_v11 = vsub.f32 %v2559_v36, %v1106_v18  ;;  %v1170_v61 = vsub.f32 %v2715_v63, %v1106_v18  ;;  %v1883_v28 = vpack.c.bf16 %v2103_v0, %v2099_v42  ;;  %2112 = vpow2.f32 %v1291_v62  ;;  %v2127_v0 = vld [vmem:[%s2211_s25 + $0x8] sm:$0xff] }
 0x352   : > { %2114 = vpow2.f32 %v1293_v3 }
 0x353   : > { %v1295_v29 = vmul.f32 1.442695, %v1169_v11  ;;  %v1297_v15 = vmul.f32 1.442695, %v1170_v61  ;;  %1884 = vmatprep.subr.bf16.mxu0 %v1883_v28  ;;  %1948 = vmatprep.subr.bf16.mxu1 %v1883_v28  ;;  %v2105_v13 = vpop.eup %2104 }
 0x354   : > { %1886 = vmatpush1.bf16.xpose.msra.mxu0 %v1885_v10  ;;  %1950 = vmatpush1.bf16.xpose.msra.mxu1 %v1885_v10  ;;  %v2107_v14 = vpop.eup %2106 }
 0x355   : > { %2116 = vpow2.f32 %v1295_v29 }
 0x356   : > { %2118 = vpow2.f32 %v1297_v15 }
 0x357   : > { %v2109_v31 = vpop.eup %2108 }
 0x358   : > { %v2111_v9 = vpop.eup %2110  ;;  %v1889_v12 = vpack.c.bf16 %v2109_v31, %v2105_v13 }
 0x359   : > { %v1887_v36 = vpack.c.bf16 %v2111_v9, %v2107_v14 }
 0x35b   : > { %1888 = vmatprep.subr.bf16.mxu0 %v1887_v36  ;;  %1952 = vmatprep.subr.bf16.mxu1 %v1887_v36  ;;  %v2113_v32 = vpop.eup %2112 }
 0x35c   : > { %1890 = vmatpush1.bf16.xpose.msra.mxu0 %v1889_v12  ;;  %1954 = vmatpush1.bf16.xpose.msra.mxu1 %v1889_v12  ;;  %v2115_v53 = vpop.eup %2114 }
 0x35f   : > { %v2117_v33 = vpop.eup %2116 }
 0x360   : > { %v2119_v1 = vpop.eup %2118  ;;  %v1893_v2 = vpack.c.bf16 %v2117_v33, %v2113_v32 }
 0x361   : > { %v1891_v54 = vpack.c.bf16 %v2119_v1, %v2115_v53 }
 0x363   : > { %1892 = vmatprep.subr.bf16.mxu0 %v1891_v54  ;;  %1956 = vmatprep.subr.bf16.mxu1 %v1891_v54 }
 0x364   : > { %1894 = vmatpush1.bf16.xpose.msra.mxu0 %v1893_v2  ;;  %1958 = vmatpush1.bf16.xpose.msra.mxu1 %v1893_v2 }
 0x36b   : > { %1364 = vmatmul.mubr.f32.vlgmr.msra.gmra.mrb[32].mxu0 %v2124_v44  ;;  %1441 = vmatmul.mubr.f32.vlgmr.msra.gmra.mrb[64].mxu1 %v2153_v39 }
 0x36c   : > { %1369 = vmatprep.mubr.f32.mxu0 %v2633_v6  ;;  %1525 = vmatprep.mubr.f32.mxu1 %v2716_v45 }
 0x36f   : > { %1370 = vmatmul.mubr.f32.gmra.mrb[34].mxu0 %v2126_v46 }
 0x3c5   : > { %v1555_v27 = vpop.permute.xlu0 %1554  ;;  %v1560_v58 = vpop.permute.xlu1 %1559 }
 0x43e   : > { %v1365_v39 = vpop.f32.mrb[32].mxu0  ;;  %v1442_v17 = vpop.f32.mrb[64].mxu1 }
 0x43f   : > { %v1367_v56 = vpop.f32.mrb[33].mxu0  ;;  %v1444_v37 = vpop.f32.mrb[65].mxu1  ;;  %2120 = vrcp.f32 %v1442_v17 }
 0x440   : > { %2122 = vrcp.f32 %v1444_v37 }
 0x442   : > { %v1371_v38 = vpop.f32.mrb[34].mxu0 }
 0x443   : > { %v1961_v57 = vpack.c.bf16 %v1371_v38, %v1365_v39  ;;  %v1373_v52 = vpop.f32.mrb[35].mxu0 }
 0x444   : > { %v1959_v19 = vpack.c.bf16 %v1373_v52, %v1367_v56 }
 0x446   : > { %1960 = vmatprep.subr.bf16.mxu1 %v1959_v19 }
 0x447   : > { %1962 = vmatpush1.bf16.msra.mxu1 %v1961_v57 }
 0x449   : > { %v2121_v4 = vpop.eup %2120 }
 0x44a   : > { %1731 = vmatmul.mubr.msk.f32.vlgmr.msra.gmra.mrb[66].mxu1 %vm336_vm0, %v327_v20  ;;  %v2123_v5 = vpop.eup %2122  ;;  %v1449_v48 = vmul.f32 %v2121_v4, %v1442_v17 }
 0x44b   : > { %1531 = vmatprep.mubr.f32.mxu1 %v2716_v45  ;;  %v1450_v40 = vmul.f32 %v2123_v5, %v1444_v37 }
 0x44c   : > { %v1451_v43 = vsub.f32 2.0, %v1449_v48 }
 0x44d   : > { %v1452_v7 = vsub.f32 2.0, %v1450_v40 }
 0x44e   : > { %1732 = vmatmul.mubr.msk.f32.gmra.mrb[68].mxu1 %vm336_vm0, %v328_v24  ;;  %v1453_v8 = vmul.f32 %v2121_v4, %v1451_v43 }
 0x44f   : > { %v1454_v50 = vmul.f32 %v2123_v5, %v1452_v7 }
 0x450   : > { %v1541_v49 = vrot.slane %v1453_v8, %v1540_v47 }
 0x451   : > { %v1545_v23 = vrot.slane %v1454_v50, %v1540_v47 }
 0x51d   : > { %v1527_v22 = vpop.f32.mrb[66].mxu1 }
 0x51e   : > { %v1546_v21 = vmul.f32 %v1541_v49, %v1527_v22  ;;  %v1529_v30 = vpop.f32.mrb[67].mxu1 }
 0x51f   : > { %v1547_v25 = vmul.f32 %v1545_v23, %v1529_v30 }
 0x520   : > { %v1562_v26 = vadd.f32 %v1555_v27, %v1546_v21 }
 0x521   : > { %v1563_v51 = vadd.f32 %v1555_v27, %v1547_v25  ;;  %v1533_v55 = vpop.f32.mrb[68].mxu1 }
 0x522   : > { %v1566_v42 = vadd.f32 %v2124_v44, %v1562_v26  ;;  %v1548_v41 = vmul.f32 %v1541_v49, %v1533_v55  ;;  %v1535_v62 = vpop.f32.mrb[69].mxu1 }
 0x523   : > { %v1567_v3 = vadd.f32 %v2127_v0, %v1563_v51  ;;  %v1549_v18 = vmul.f32 %v1545_v23, %v1535_v62 }
 0x524   : > { %1570 = vst [vmem:[%s246_s17] sm:$0xff] %v1566_v42  ;;  %v1564_v10 = vadd.f32 %v1560_v58, %v1548_v41 }
 0x525   : > { %1571 = vst [vmem:[%s246_s17 + $0x8] sm:$0xff] %v1567_v3  ;;  %v1565_v11 = vadd.f32 %v1560_v58, %v1549_v18 }
 0x526   : > { %v1568_v63 = vadd.f32 %v2126_v46, %v1564_v10 }
 0x527   : > { %v1569_v61 = vadd.f32 %v2633_v6, %v1565_v11 }
 0x528   : > { %1572 = vst [vmem:[%s246_s17 + $0x10] sm:$0xff] %v1568_v63 }
 0x529   : > { %1573 = vst [vmem:[%s246_s17 + $0x18] sm:$0xff] %v1569_v61 }
 0x52a PF: > { %s15_s20 = sadd.s32 1, %s2150_s20   ;;  %s2717_s18 = smov %s2146_s19 }
 0x52b   : > { %p12_p5 = scmp.ge.s32.totalorder %s15_s20, 4   ;;  %s2718_s19 = smov %s2720_s21 }
 0x52d   :  { %14 = sbr.rel (!%p12_p5) target bundleno = 2 (0x2), region = 71 }

</bundles_post_ra>
